<compile_context>
chip_gen: v5e
topology: v5e:2x2
jax: 0.10.0
libtpu: 0.0.40
codegen_flags: <defaults>
</compile_context>

<pallas_src>
import jax
import jax.numpy as jnp
from jax.experimental import pallas as pl
from jax.experimental.pallas import tpu as pltpu

_HIDDEN = 128


def _round_up(x, m):
    return ((x + m - 1) // m) * m


def mlp_kernel(x_ref, w1_ref, b1_ref, w2_ref, b2_ref, o_ref):
    # Layer 1: Linear(input_size, 128) + ReLU.
    # x arrives as original f32 rows; cast to bf16 here (VPU) so HBM only ever
    # sees the unpadded f32 x once. f32 accumulation on the MXU.
    h = jnp.dot(x_ref[...].astype(jnp.bfloat16), w1_ref[...],
                preferred_element_type=jnp.float32)
    h = jnp.maximum(h + b1_ref[...], 0.0)          # f32 epilogue (v5e-safe)
    # Dropout(p=0.3): identity in eval mode.
    # TODO(synk): training-mode dropout (pltpu.prng_random_bits mask + 1/(1-p)
    #             scaling) intentionally not emitted; eval forward is the target.
    # Layer 2: Linear(128, num_classes), written at the true class width.
    y = jnp.dot(h.astype(jnp.bfloat16), w2_ref[...],
                preferred_element_type=jnp.float32)
    o_ref[...] = (y + b2_ref[...]).astype(o_ref.dtype)


def prepare_params(w1, b1, w2, b2):
    """One-time parameter prep, hoisted out of the per-call path:
    bf16 matmul weights, f32 [1, out] biases."""
    return (w1.astype(jnp.bfloat16),
            jnp.asarray(b1, jnp.float32).reshape(1, -1),
            w2.astype(jnp.bfloat16),
            jnp.asarray(b2, jnp.float32).reshape(1, -1))


def classifier_forward(x, w1, b1, w2, b2, *, max_block_b=2048,
                       out_dtype=jnp.float32):
    """Eval-mode forward of Classifier.

    x:  [B, input_size] float32
    w1: [input_size, 128] (bf16 preferred; see prepare_params), b1: [1, 128]
    w2: [128, num_classes], b2: [1, num_classes]
    Weights are stored [in, out] (transpose of PyTorch's [out, in]).
    """
    B, K = x.shape
    hidden = w1.shape[1]
    num_classes = w2.shape[1]
    out_bytes = jnp.dtype(out_dtype).itemsize

    # Defensive casts (no-ops when params came from prepare_params).
    w1 = w1 if w1.dtype == jnp.bfloat16 else w1.astype(jnp.bfloat16)
    w2 = w2 if w2.dtype == jnp.bfloat16 else w2.astype(jnp.bfloat16)
    b1 = jnp.asarray(b1, jnp.float32).reshape(1, hidden)
    b2 = jnp.asarray(b2, jnp.float32).reshape(1, num_classes)

    # ---- VMEM accounting ----------------------------------------------------
    # Weights counted 2x: constant-index inputs are still allocated with the
    # pipeline's default double buffer. Temporaries: h f32 + h bf16 + y f32.
    weight_vmem = 2 * (K * hidden * 2 + hidden * 4
                       + hidden * num_classes * 2 + num_classes * 4)
    per_row = (2 * K * 4                        # x double-buffered (f32)
               + 2 * num_classes * out_bytes    # out double-buffered
               + hidden * 6                     # h f32 + h bf16
               + num_classes * 4)               # y f32
    budget = 36 * 1024 * 1024                   # headroom under v7x's 64 MiB
    tb_cap = max(8, ((budget - weight_vmem) // per_row) // 8 * 8)

    # ---- batch tile: grow toward the VMEM budget (amortize ~0.35 us/step) ----
    TB = max(8, min(_round_up(B, 8), max_block_b, tb_cap))
    # v7x megacore: prefer an even number of batch tiles so the "parallel"
    # axis load-balances across the two TensorCores.
    nt = -(-B // TB)
    if nt > 1 and nt % 2 == 1:
        nt += 1
        TB = max(8, min(TB, _round_up(-(-B // nt), 8)))
    Bp = _round_up(B, TB)

    # Pad the batch only when needed (no feature pad, no dtype cast on x).
    xp = x if Bp == B else jnp.pad(x, ((0, Bp - B), (0, 0)))

    vmem_need = weight_vmem + TB * per_row
    vmem_limit = int(min(max(vmem_need + (4 << 20), 16 << 20), 40 << 20))

    flops = 2 * Bp * (K * hidden + hidden * num_classes)
    bytes_accessed = (Bp * K * 4 + K * hidden * 2 + hidden * 4
                      + hidden * num_classes * 2 + num_classes * 4
                      + Bp * num_classes * out_bytes)

    out = pl.pallas_call(
        mlp_kernel,
        out_shape=jax.ShapeDtypeStruct((Bp, num_classes), out_dtype),
        grid=(Bp // TB,),
        in_specs=[
            pl.BlockSpec((TB, K), lambda i: (i, 0)),                # x streamed
            pl.BlockSpec((K, hidden), lambda i: (0, 0)),            # w1 resident
            pl.BlockSpec((1, hidden), lambda i: (0, 0)),            # b1 resident
            pl.BlockSpec((hidden, num_classes), lambda i: (0, 0)),  # w2 resident
            pl.BlockSpec((1, num_classes), lambda i: (0, 0)),       # b2 resident
        ],
        out_specs=pl.BlockSpec((TB, num_classes), lambda i: (i, 0)),
        compiler_params=pltpu.CompilerParams(
            dimension_semantics=("parallel",),
            vmem_limit_bytes=vmem_limit),
        cost_estimate=pl.CostEstimate(
            flops=flops, transcendentals=0, bytes_accessed=bytes_accessed),
    )(xp, w1, b1, w2, b2)

    return out if Bp == B else out[:B]


def init_params(key, input_size, num_classes, hidden=_HIDDEN):
    """PyTorch nn.Linear default init: U(-1/sqrt(fan_in), 1/sqrt(fan_in))."""
    k1, k2, k3, k4 = jax.random.split(key, 4)
    bound1 = 1.0 / (input_size ** 0.5)
    bound2 = 1.0 / (hidden ** 0.5)
    # stored as [in, out] (transpose of PyTorch's [out, in])
    w1 = jax.random.uniform(k1, (input_size, hidden), jnp.float32, -bound1, bound1)
    b1 = jax.random.uniform(k2, (1, hidden), jnp.float32, -bound1, bound1)
    w2 = jax.random.uniform(k3, (hidden, num_classes), jnp.float32, -bound2, bound2)
    b2 = jax.random.uniform(k4, (1, num_classes), jnp.float32, -bound2, bound2)
    return w1, b1, w2, b2


if __name__ == "__main__":
    key = jax.random.PRNGKey(0)
    k_x, k_p = jax.random.split(key)

    batch = 2
    input_size = 32
    num_classes = 8

    x = jax.random.normal(k_x, (batch, input_size), jnp.float32)
    w1, b1, w2, b2 = init_params(k_p, input_size, num_classes)
    w1b, b1f, w2b, b2f = prepare_params(w1, b1, w2, b2)   # one-time weight prep

    out = classifier_forward(x, w1b, b1f, w2b, b2f)
    out = jax.block_until_ready(out)
    assert out.shape == (batch, num_classes)
    assert out.dtype == jnp.float32

    # Reference with the same bf16 operand rounding (f32 accumulation).
    xr = x.astype(jnp.bfloat16).astype(jnp.float32)
    w1r = w1.astype(jnp.bfloat16).astype(jnp.float32)
    w2r = w2.astype(jnp.bfloat16).astype(jnp.float32)
    h = jnp.maximum(xr @ w1r + b1, 0.0)
    ref = h.astype(jnp.bfloat16).astype(jnp.float32) @ w2r + b2
    assert jnp.allclose(out, ref, atol=2e-3, rtol=2e-3)

    # Loose check against the pure-f32 module semantics (dropout = identity).
    ref_f32 = jnp.maximum(x @ w1 + b1, 0.0) @ w2 + b2
    assert jnp.allclose(out, ref_f32, atol=5e-2, rtol=5e-2)

    print("KERNEL_OK")
</pallas_src>

<mosaic_0001>
module attributes {stable_mosaic.version = 11 : i64} {
  func.func @mlp_kernel(%arg0: i32, %arg1: memref<8x32xf32, #tpu.memory_space<vmem>>, %arg2: memref<32x128xbf16, #tpu.memory_space<vmem>>, %arg3: memref<1x128xf32, #tpu.memory_space<vmem>>, %arg4: memref<128x8xbf16, #tpu.memory_space<vmem>>, %arg5: memref<1x8xf32, #tpu.memory_space<vmem>>, %arg6: memref<8x8xf32, #tpu.memory_space<vmem>>) attributes {dimension_semantics = [#tpu.dimension_semantics<parallel>], iteration_bounds = array<i64: 1>, scalar_prefetch = 0 : i64, scratch_operands = 0 : i64, tpu.core_type = #tpu.core_type<tc>, window_params = [{transform_indices = @transform_0, window_bounds = array<i64: 8, 32>}, {pipeline_mode = #tpu.pipeline_mode<synchronous>, transform_indices = @transform_1, window_bounds = array<i64: 32, 128>}, {pipeline_mode = #tpu.pipeline_mode<synchronous>, transform_indices = @transform_2, window_bounds = array<i64: 1, 128>}, {pipeline_mode = #tpu.pipeline_mode<synchronous>, transform_indices = @transform_3, window_bounds = array<i64: 128, 8>}, {pipeline_mode = #tpu.pipeline_mode<synchronous>, transform_indices = @transform_4, window_bounds = array<i64: 1, 8>}, {transform_indices = @transform_5, window_bounds = array<i64: 8, 8>}]} {
    %c0 = arith.constant 0 : index
    %c0_0 = arith.constant 0 : index
    %0 = vector.load %arg1[%c0, %c0_0] : memref<8x32xf32, #tpu.memory_space<vmem>>, vector<8x32xf32>
    %1 = arith.truncf %0 : vector<8x32xf32> to vector<8x32xbf16>
    %c0_1 = arith.constant 0 : index
    %c0_2 = arith.constant 0 : index
    %2 = vector.load %arg2[%c0_1, %c0_2] : memref<32x128xbf16, #tpu.memory_space<vmem>>, vector<32x128xbf16>
    %cst = arith.constant dense<0.000000e+00> : vector<8x128xf32>
    %3 = tpu.matmul %1, %2, %cst {dimension_numbers = #tpu.dot_dimension_numbers<[1], [0], [0], [1], [0, 0, 1, 1], [], []>} : vector<8x32xbf16>, vector<32x128xbf16>, vector<8x128xf32> -> vector<8x128xf32>
    %c0_3 = arith.constant 0 : index
    %c0_4 = arith.constant 0 : index
    %4 = vector.load %arg3[%c0_3, %c0_4] : memref<1x128xf32, #tpu.memory_space<vmem>>, vector<1x128xf32>
    %5 = vector.broadcast %4 : vector<1x128xf32> to vector<8x128xf32>
    %6 = arith.addf %3, %5 : vector<8x128xf32>
    %cst_5 = arith.constant 0.000000e+00 : f32
    %7 = vector.broadcast %cst_5 : f32 to vector<8x128xf32>
    %8 = arith.maximumf %6, %7 : vector<8x128xf32>
    %9 = arith.truncf %8 : vector<8x128xf32> to vector<8x128xbf16>
    %c0_6 = arith.constant 0 : index
    %c0_7 = arith.constant 0 : index
    %10 = vector.load %arg4[%c0_6, %c0_7] : memref<128x8xbf16, #tpu.memory_space<vmem>>, vector<128x8xbf16>
    %cst_8 = arith.constant dense<0.000000e+00> : vector<8x8xf32>
    %11 = tpu.matmul %9, %10, %cst_8 {dimension_numbers = #tpu.dot_dimension_numbers<[1], [0], [0], [1], [0, 0, 1, 1], [], []>} : vector<8x128xbf16>, vector<128x8xbf16>, vector<8x8xf32> -> vector<8x8xf32>
    %c0_9 = arith.constant 0 : index
    %c0_10 = arith.constant 0 : index
    %12 = vector.load %arg5[%c0_9, %c0_10] : memref<1x8xf32, #tpu.memory_space<vmem>>, vector<1x8xf32>
    %13 = vector.broadcast %12 : vector<1x8xf32> to vector<8x8xf32>
    %14 = arith.addf %11, %13 : vector<8x8xf32>
    %c0_11 = arith.constant 0 : index
    %c0_12 = arith.constant 0 : index
    %15 = vector.load %arg6[%c0_11, %c0_12] : memref<8x8xf32, #tpu.memory_space<vmem>>, vector<8x8xf32>
    tpu.vector_store %arg6[%c0_11, %c0_12], %14 {strides = array<i32>} : memref<8x8xf32, #tpu.memory_space<vmem>>, vector<8x8xf32>,
    return
  }
  func.func @transform_0(%arg0: i32) -> (i32, i32) {
    %c0_i32 = arith.constant 0 : i32
    %c0_i32_0 = arith.constant 0 : i32
    return %arg0, %c0_i32 : i32, i32
  }
  func.func @transform_1(%arg0: i32) -> (i32, i32) {
    %c0_i32 = arith.constant 0 : i32
    %c0_i32_0 = arith.constant 0 : i32
    %c0_i32_1 = arith.constant 0 : i32
    return %c0_i32, %c0_i32_0 : i32, i32
  }
  func.func @transform_2(%arg0: i32) -> (i32, i32) {
    %c0_i32 = arith.constant 0 : i32
    %c0_i32_0 = arith.constant 0 : i32
    %c0_i32_1 = arith.constant 0 : i32
    return %c0_i32, %c0_i32_0 : i32, i32
  }
  func.func @transform_3(%arg0: i32) -> (i32, i32) {
    %c0_i32 = arith.constant 0 : i32
    %c0_i32_0 = arith.constant 0 : i32
    %c0_i32_1 = arith.constant 0 : i32
    return %c0_i32, %c0_i32_0 : i32, i32
  }
  func.func @transform_4(%arg0: i32) -> (i32, i32) {
    %c0_i32 = arith.constant 0 : i32
    %c0_i32_0 = arith.constant 0 : i32
    %c0_i32_1 = arith.constant 0 : i32
    return %c0_i32, %c0_i32_0 : i32, i32
  }
  func.func @transform_5(%arg0: i32) -> (i32, i32) {
    %c0_i32 = arith.constant 0 : i32
    %c0_i32_0 = arith.constant 0 : i32
    return %arg0, %c0_i32 : i32, i32
  }
}

</mosaic_0001>

<bundles_post_ra>
// kernel: tpu_custom_call.1
= control target key start
LH: loop header
LB: loop body
LE: loop exit
PB: predicated region body
PF: predicated region fallthrough
CT: control target
= control target key end

     0   :  { %s315_s0 = inlined_call_operand.vmem [shape: f32[8,32], index: 0, kind: input, shape index: {}]   ;;  %s316_s1 = inlined_call_operand.vmem [shape: bf16[32,128], index: 1, kind: input, shape index: {}]   ;;  %s317_s2 = inlined_call_operand.vmem [shape: f32[1,128], index: 2, kind: input, shape index: {}]   ;;  %s318_s3 = inlined_call_operand.vmem [shape: bf16[128,8], index: 3, kind: input, shape index: {}]   ;;  %s319_s4 = inlined_call_operand.vmem [shape: f32[1,8], index: 4, kind: input, shape index: {}]   ;;  %s320_s5 = inlined_call_operand.hbm [shape: f32[8,8], index: 5, kind: output, shape index: {}]  }
   0x1   :  { %v204_v0 = vld [vmem:[%s316_s1 + $0x8] sm:$0xff]  ;;  %v212_v1 = vld [vmem:[%s318_s3 + $0x38] sm:$0xff]  ;;  %v203_v2 = vld [vmem:[%s316_s1] sm:$0xff] }
   0x2   :  { %54 = vmatpush.bf16.msra.mxu0 %v204_v0  ;;  %v22_v3 = vld [vmem:[%s315_s0] sm:$0xff]  ;;  %131 = vmatpush.bf16.msra.mxu1 %v212_v1  ;;  %v211_v4 = vld [vmem:[%s318_s3 + $0x30] sm:$0xff] }
   0x3   :  { %10 = vsyncpa [#allocation3], 0  ;;  %v23_v5 = vpack.c.bf16 %v22_v3, %v22_v3  ;;  %vm44_vm0 = vcmask 261120   ;;  %v210_v6 = vld [vmem:[%s318_s3 + $0x28] sm:$0xff]  ;;  %v209_v7 = vld [vmem:[%s318_s3 + $0x20] sm:$0xff]  ;;  %s242_s17 = smov [#allocation2]  }
   0x4   :  { %v208_v8 = vld [vmem:[%s318_s3 + $0x18] sm:$0xff]  ;;  %v207_v9 = vld [vmem:[%s318_s3 + $0x10] sm:$0xff]  ;;  %v206_v10 = vld [vmem:[%s318_s3 + $0x8] sm:$0xff]  ;;  %s151_s18 = sshll.u32 %s242_s17, 4  ;;  %vm144_vm1 = vcmask 64512   ;;  %s152_s18 = int_to_ptr.vmem [resolvable:$true] %s151_s18 }
   0x5   :  { %v205_v11 = vld [vmem:[%s318_s3] sm:$0xff]  ;;  %s153_s3 = sshll.u32 %s320_s5, 4  ;;  %s154_s3 = int_to_ptr.hbm [resolvable:$true] %s153_s3 }
   0x6   :  { %55 = vmatpush.bf16.msra.mxu0 %v203_v2  ;;  %132 = vmatpush.bf16.msra.mxu1 %v211_v4  ;;  %v214_v12 = vld [vmem:[%s317_s2] ss:$0 sm:$0xff] }
   0x7   :  { %v215_v18 = vld [vmem:[%s319_s4] ss:$0 sm:$0xff] }
   0x9   :  { %170 = vmatmul.msk.bf16.vlgmr.msra.gmra.mxu0 %vm44_vm0, %v23_v5 }
   0xa   :  { %133 = vmatpush.bf16.msra.mxu1 %v210_v6 }
   0xe   :  { %134 = vmatpush.bf16.msra.mxu1 %v209_v7 }
  0x12   :  { %135 = vmatpush.bf16.msra.mxu1 %v208_v8 }
  0x16   :  { %136 = vmatpush.bf16.msra.mxu1 %v207_v9 }
  0x1a   :  { %137 = vmatpush.bf16.msra.mxu1 %v206_v10 }
  0x1e   :  { %138 = vmatpush.bf16.msra.mxu1 %v205_v11 }
  0x86   :  { %v57_v13 = vpop.f32.mrf.mxu0 }
  0x87   :  { %v58_v14 = vadd.f32 %v214_v12, %v57_v13 }
  0x89   :  { %v61_v15 = vmax.f32 %v58_v14, 0.0 }
  0x8b   :  { %v62_v16 = vpack.c.bf16 %v61_v15, %v61_v15 }
  0x8d   :  { %139 = vmatmul.bf16.vlgmr.msra.gmra.mxu1 %v62_v16 }
  0x8e   :  { %v59_v17 = vpop.f32.mrf.mxu0 }
 0x10a   :  { %v140_v19 = vpop.f32.mrf.mxu1 }
 0x10b   :  { %v141_v20 = vadd.f32 %v215_v18, %v140_v19 }
 0x10d   :  { %145 = vst.msk [vmem:[#allocation2] sm:$0xff] %vm144_vm1, %v141_v20 }
 0x10e   :  { %156 = dma.vmem_to_hbm [thread:$0]  %s152_s18, 128, %s154_s3, [#allocation3]  }
 0x112   :  { %v142_v21 = vpop.f32.mrf.mxu1 }
 0x113   :  { %240 = dma.done.wait [#allocation3], 128  }
 0x114   :  { %241 = vsyncadd [#allocation3], 4294967168 }
 0x115   :  { %161 = vsyncpa [#allocation3], 1 }

</bundles_post_ra>
